<compile_context>
chip_gen: v5e
topology: v5e:2x2
jax: 0.10.0
libtpu: 0.0.40
codegen_flags: <defaults>
</compile_context>

<pallas_src>
import functools

import jax
import jax.numpy as jnp
from jax.experimental import pallas as pl
from jax.experimental.pallas import tpu as pltpu

_LANES = 128
_SUB = 16  # bf16 sublane packing: keep row offsets / tiles 16-aligned


def _round_up(n, m):
    return ((n + m - 1) // m) * m


def _pack_params(w1, b1, w2, b2, w3, b3):
    """Pack all parameters into ONE lane-padded bf16 slab of shape (rows, 128).

    Row layout (rF = round_up(F, 16)):
      [0, rF)            : W1 zero-padded to (rF, 128)
      [rF, rF+128)       : W2 zero-padded to (128, 128)
      [rF+128, rF+144)   : "tail" block of 16 rows:
                             row 0 = b1, row 1 = b2, row 2 = b3,
                             rows 8..8+O-1 = w3^T (row j = w3[:, j])
    All padding is zeros, so padded lanes/rows contribute exact zeros.
    """
    F, H1 = w1.shape
    _, H2 = w2.shape
    _, O = w3.shape
    assert H1 <= _LANES and H2 <= _LANES and O <= 8
    rF = _round_up(F, _SUB)

    w1p = jnp.zeros((rF, _LANES), jnp.float32).at[:F, :H1].set(w1.astype(jnp.float32))
    w2p = jnp.zeros((_LANES, _LANES), jnp.float32).at[:H1, :H2].set(w2.astype(jnp.float32))
    tail = jnp.zeros((_SUB, _LANES), jnp.float32)
    tail = tail.at[0, :H1].set(b1.astype(jnp.float32))
    tail = tail.at[1, :H2].set(b2.astype(jnp.float32))
    tail = tail.at[2, :O].set(b3.astype(jnp.float32))
    tail = tail.at[8:8 + O, :H2].set(w3.astype(jnp.float32).T)

    slab = jnp.concatenate([w1p, w2p, tail], axis=0).astype(jnp.bfloat16)
    return slab, rF  # slab: (rF + 144, 128) bf16


def _ann_kernel(x_ref, p_ref, o_ref, *, rf, n_out):
    x = x_ref[...]                                         # (tb, rf) bf16

    # Tile-aligned static slices of the VMEM-resident parameter slab.
    w1 = p_ref[0:rf, :]                                    # (rf, 128) bf16
    w2 = p_ref[rf:rf + _LANES, :]                          # (128, 128) bf16
    tail = p_ref[rf + _LANES:rf + _LANES + _SUB, :].astype(jnp.float32)  # (16,128)
    b1 = tail[0:1, :]
    b2 = tail[1:2, :]
    b3 = tail[2:3, :]

    # Layers 1 & 2 on the MXU: bf16 operands, f32 accumulate.
    h = jnp.dot(x, w1, preferred_element_type=jnp.float32) + b1
    h = jnp.maximum(h, 0.0)
    h = jnp.dot(h.astype(jnp.bfloat16), w2, preferred_element_type=jnp.float32) + b2
    h = jnp.maximum(h, 0.0)                                # (tb, 128) f32; lanes >= H2 are 0

    # Layer 3 (hidden2 -> n_out) off the MXU: per output column j,
    # out[:, j] = sum_lanes(h * w3[:, j]) via VPU multiply + XLU reduction.
    cols = [
        jnp.sum(h * tail[8 + j:9 + j, :], axis=-1, keepdims=True)  # (tb, 1)
        for j in range(n_out)
    ]
    out = jnp.concatenate(cols, axis=-1) + b3[:, :n_out]   # (tb, n_out) f32
    o_ref[...] = out.astype(o_ref.dtype)


def make_ann_forward(w1, b1, w2, b2, w3, b3, *, block_rows=2048):
    """Pack parameters once; return a jitted forward(x) -> (B, out_features) f32."""
    F, H1 = w1.shape
    H2 = w2.shape[1]
    O = w3.shape[1]
    slab, rF = _pack_params(w1, b1, w2, b2, w3, b3)        # packed ONCE, not per call
    kernel = functools.partial(_ann_kernel, rf=rF, n_out=O)

    @jax.jit
    def forward(x):
        B = x.shape[0]
        assert x.shape[1] == F

        # Batch tile: multiple of 16 (bf16 sublane packing), big enough to
        # amortize per-step overhead, capped at ceil(B/2) so the grid has >= 2
        # steps whenever B allows (v7x megacore), and <= block_rows (v5e VMEM).
        b_al = _round_up(B, _SUB)
        half = _round_up(pl.cdiv(b_al, 2), _SUB)
        tb = max(_SUB, min(_round_up(block_rows, _SUB), half))
        Bp = _round_up(B, tb)

        # bf16 input, features zero-padded to the slab's 16-aligned K, batch
        # zero-padded to a whole number of tiles (padded rows sliced off below).
        x_p = jnp.zeros((Bp, rF), jnp.bfloat16).at[:B, :F].set(x.astype(jnp.bfloat16))

        flops = 2 * B * (F * H1 + H1 * H2 + H2 * O)
        bytes_accessed = Bp * rF * 2 + Bp * O * 4 + int(slab.size) * 2

        out = pl.pallas_call(
            kernel,
            out_shape=jax.ShapeDtypeStruct((Bp, O), jnp.float32),
            grid=(Bp // tb,),
            in_specs=[
                # Batch-tiled input: (tb, rF) block per grid step.
                pl.BlockSpec((tb, rF), lambda i: (i, 0)),
                # Parameter slab: constant index_map -> DMA'd once, VMEM-resident.
                pl.BlockSpec(slab.shape, lambda i: (0, 0)),
            ],
            out_specs=pl.BlockSpec((tb, O), lambda i: (i, 0)),
            compiler_params=pltpu.CompilerParams(
                dimension_semantics=("parallel",),
            ),
            cost_estimate=pl.CostEstimate(
                flops=flops, transcendentals=0, bytes_accessed=bytes_accessed
            ),
        )(x_p, slab)
        # TODO(synk): optional lane-dense (Bp//64, 128) output + wrapper reshape if
        # profiling ever shows the narrow (tb, 2) writeback in the epilogue.
        return out[:B]

    return forward


def init_params(key, input_features=8, hidden1=20, hidden2=20, out_features=2):
    # Deterministic synthetic init (PyTorch-style uniform bounds), not a checkpoint.
    ks = jax.random.split(key, 6)

    def linear(kw, kb, fan_in, fan_out):
        bound = 1.0 / jnp.sqrt(fan_in)
        w = jax.random.uniform(kw, (fan_in, fan_out), jnp.float32, -bound, bound)
        b = jax.random.uniform(kb, (fan_out,), jnp.float32, -bound, bound)
        return w, b

    w1, b1 = linear(ks[0], ks[1], input_features, hidden1)
    w2, b2 = linear(ks[2], ks[3], hidden1, hidden2)
    w3, b3 = linear(ks[4], ks[5], hidden2, out_features)
    return w1, b1, w2, b2, w3, b3


if __name__ == "__main__":
    key = jax.random.PRNGKey(0)
    k_x, k_p, k_x2 = jax.random.split(key, 3)

    params = init_params(k_p, input_features=8, hidden1=20, hidden2=20, out_features=2)
    w1, b1, w2, b2, w3, b3 = params

    def ref_fn(xx):  # f32 reference (kernel uses bf16 matmul operands -> loose tol)
        h = jnp.maximum(xx @ w1 + b1, 0.0)
        h = jnp.maximum(h @ w2 + b2, 0.0)
        return h @ w3 + b3

    # Parameters packed once, outside the per-call hot path.
    fwd = make_ann_forward(*params)

    # Small demo shape consistent with the module (Pima dataset: 8 features).
    batch = 8
    x = jax.random.normal(k_x, (batch, 8), dtype=jnp.float32)
    out = jax.block_until_ready(fwd(x))
    assert out.shape == (batch, 2)
    assert jnp.allclose(out, ref_fn(x), atol=5e-2, rtol=5e-2)

    # Exercise the multi-block grid + ragged-batch padding path (still small).
    fwd_small = make_ann_forward(*params, block_rows=64)
    x2 = jax.random.normal(k_x2, (200, 8), dtype=jnp.float32)
    out2 = jax.block_until_ready(fwd_small(x2))
    assert out2.shape == (200, 2)
    assert jnp.allclose(out2, ref_fn(x2), atol=5e-2, rtol=5e-2)

    print("KERNEL_OK")
</pallas_src>

<mosaic_0001>
module attributes {stable_mosaic.version = 11 : i64} {
  func.func @_ann_kernel(%arg0: i32, %arg1: memref<16x16xbf16, #tpu.memory_space<vmem>>, %arg2: memref<160x128xbf16, #tpu.memory_space<vmem>>, %arg3: memref<16x2xf32, #tpu.memory_space<vmem>>) attributes {dimension_semantics = [#tpu.dimension_semantics<parallel>], iteration_bounds = array<i64: 1>, scalar_prefetch = 0 : i64, scratch_operands = 0 : i64, tpu.core_type = #tpu.core_type<tc>, window_params = [{transform_indices = @transform_0, window_bounds = array<i64: 16, 16>}, {pipeline_mode = #tpu.pipeline_mode<synchronous>, transform_indices = @transform_1, window_bounds = array<i64: 160, 128>}, {transform_indices = @transform_2, window_bounds = array<i64: 16, 2>}]} {
    %c0 = arith.constant 0 : index
    %c0_0 = arith.constant 0 : index
    %0 = vector.load %arg1[%c0, %c0_0] : memref<16x16xbf16, #tpu.memory_space<vmem>>, vector<16x16xbf16>
    %c0_1 = arith.constant 0 : index
    %c0_2 = arith.constant 0 : index
    %1 = vector.load %arg2[%c0_1, %c0_2] : memref<160x128xbf16, #tpu.memory_space<vmem>>, vector<16x128xbf16>
    %c16 = arith.constant 16 : index
    %c0_3 = arith.constant 0 : index
    %2 = vector.load %arg2[%c16, %c0_3] : memref<160x128xbf16, #tpu.memory_space<vmem>>, vector<128x128xbf16>
    %c144 = arith.constant 144 : index
    %c0_4 = arith.constant 0 : index
    %3 = vector.load %arg2[%c144, %c0_4] : memref<160x128xbf16, #tpu.memory_space<vmem>>, vector<16x128xbf16>
    %4 = arith.extf %3 : vector<16x128xbf16> to vector<16x128xf32>
    %5 = vector.extract_strided_slice %4 {offsets = [0, 0], sizes = [1, 128], strides = [1, 1]} : vector<16x128xf32> to vector<1x128xf32>
    %6 = vector.extract_strided_slice %4 {offsets = [1, 0], sizes = [1, 128], strides = [1, 1]} : vector<16x128xf32> to vector<1x128xf32>
    %7 = vector.extract_strided_slice %4 {offsets = [2, 0], sizes = [1, 128], strides = [1, 1]} : vector<16x128xf32> to vector<1x128xf32>
    %cst = arith.constant dense<0.000000e+00> : vector<16x128xf32>
    %8 = tpu.matmul %0, %1, %cst {dimension_numbers = #tpu.dot_dimension_numbers<[1], [0], [0], [1], [0, 0, 1, 1], [], []>} : vector<16x16xbf16>, vector<16x128xbf16>, vector<16x128xf32> -> vector<16x128xf32>
    %9 = vector.broadcast %5 : vector<1x128xf32> to vector<16x128xf32>
    %10 = arith.addf %8, %9 : vector<16x128xf32>
    %cst_5 = arith.constant 0.000000e+00 : f32
    %11 = vector.broadcast %cst_5 : f32 to vector<16x128xf32>
    %12 = arith.maximumf %10, %11 : vector<16x128xf32>
    %13 = arith.truncf %12 : vector<16x128xf32> to vector<16x128xbf16>
    %cst_6 = arith.constant dense<0.000000e+00> : vector<16x128xf32>
    %14 = tpu.matmul %13, %2, %cst_6 {dimension_numbers = #tpu.dot_dimension_numbers<[1], [0], [0], [1], [0, 0, 1, 1], [], []>} : vector<16x128xbf16>, vector<128x128xbf16>, vector<16x128xf32> -> vector<16x128xf32>
    %15 = vector.broadcast %6 : vector<1x128xf32> to vector<16x128xf32>
    %16 = arith.addf %14, %15 : vector<16x128xf32>
    %cst_7 = arith.constant 0.000000e+00 : f32
    %17 = vector.broadcast %cst_7 : f32 to vector<16x128xf32>
    %18 = arith.maximumf %16, %17 : vector<16x128xf32>
    %19 = vector.extract_strided_slice %4 {offsets = [8, 0], sizes = [1, 128], strides = [1, 1]} : vector<16x128xf32> to vector<1x128xf32>
    %20 = vector.broadcast %19 : vector<1x128xf32> to vector<16x128xf32>
    %21 = arith.mulf %18, %20 : vector<16x128xf32>
    %cst_8 = arith.constant dense<0.000000e+00> : vector<16xf32>
    %22 = vector.multi_reduction <add>, %21, %cst_8 [1] : vector<16x128xf32> to vector<16xf32>
    %23 = vector.shape_cast %22 : vector<16xf32> to vector<16x1xf32>
    %24 = vector.extract_strided_slice %4 {offsets = [9, 0], sizes = [1, 128], strides = [1, 1]} : vector<16x128xf32> to vector<1x128xf32>
    %25 = vector.broadcast %24 : vector<1x128xf32> to vector<16x128xf32>
    %26 = arith.mulf %18, %25 : vector<16x128xf32>
    %cst_9 = arith.constant dense<0.000000e+00> : vector<16xf32>
    %27 = vector.multi_reduction <add>, %26, %cst_9 [1] : vector<16x128xf32> to vector<16xf32>
    %28 = vector.shape_cast %27 : vector<16xf32> to vector<16x1xf32>
    %29 = tpu.concatenate %23, %28 in 1 : vector<16x1xf32>, vector<16x1xf32> -> vector<16x2xf32>
    %30 = vector.extract_strided_slice %7 {offsets = [0, 0], sizes = [1, 2], strides = [1, 1]} : vector<1x128xf32> to vector<1x2xf32>
    %31 = vector.broadcast %30 : vector<1x2xf32> to vector<16x2xf32>
    %32 = arith.addf %29, %31 : vector<16x2xf32>
    %c0_10 = arith.constant 0 : index
    %c0_11 = arith.constant 0 : index
    %33 = vector.load %arg3[%c0_10, %c0_11] : memref<16x2xf32, #tpu.memory_space<vmem>>, vector<16x2xf32>
    tpu.vector_store %arg3[%c0_10, %c0_11], %32 {strides = array<i32>} : memref<16x2xf32, #tpu.memory_space<vmem>>, vector<16x2xf32>,
    return
  }
  func.func @transform_0(%arg0: i32) -> (i32, i32) {
    %c0_i32 = arith.constant 0 : i32
    %c0_i32_0 = arith.constant 0 : i32
    return %arg0, %c0_i32 : i32, i32
  }
  func.func @transform_1(%arg0: i32) -> (i32, i32) {
    %c0_i32 = arith.constant 0 : i32
    %c0_i32_0 = arith.constant 0 : i32
    %c0_i32_1 = arith.constant 0 : i32
    return %c0_i32, %c0_i32_0 : i32, i32
  }
  func.func @transform_2(%arg0: i32) -> (i32, i32) {
    %c0_i32 = arith.constant 0 : i32
    %c0_i32_0 = arith.constant 0 : i32
    return %arg0, %c0_i32 : i32, i32
  }
}

</mosaic_0001>

<bundles_post_ra>
// kernel: forward.1
= control target key start
LH: loop header
LB: loop body
LE: loop exit
PB: predicated region body
PF: predicated region fallthrough
CT: control target
= control target key end

     0   :  { %7 = vsyncpa [#allocation3], 0  ;;  %s263_s12 = smov [#allocation2]   ;;  %s264_s14 = smov 64   ;;  %s293_s0 = inlined_call_operand.vmem [shape: bf16[16,16], index: 0, kind: input, shape index: {}]   ;;  %s294_s1 = inlined_call_operand.hbm [shape: bf16[160,128], index: 1, kind: input, shape index: {}]   ;;  %s295_s2 = inlined_call_operand.vmem [shape: f32[16,2], index: 2, kind: output, shape index: {}]  }
   0x1   :  { %s14_s11 = sshll.u32 %s294_s1, 4  ;;  %s16_s13 = sshll.u32 %s263_s12, 4  ;;  %s15_s11 = int_to_ptr.hbm [resolvable:$true] %s14_s11  ;;  %s17_s13 = int_to_ptr.vmem [resolvable:$true] %s16_s13 }
   0x2   :  { %s265_s15 = smov 4  }
   0x3   :  { %22 = dma.hbm_to_vmem [thread:$0]  %s15_s11, 1280, %s17_s13, [#allocation3], %s264_s14, %s264_s14, %s265_s15  }
   0x4   :  { %261 = dma.done.wait [#allocation3], 1280  }
   0x5   :  { %262 = vsyncadd [#allocation3], 4294966016  ;;  %v220_v0 = vld [vmem:[#allocation2] sm:$0xff]  ;;  %vm64_vm0 = vcmask 130048   ;;  %v227_v3 = vld [vmem:[#allocation2 + $0x38] sm:$0xff]  ;;  %vm164_vm1 = vcmask 7168  }
   0x6   :  { %v228_v1 = vld [vmem:[#allocation2 + $0x40] sm:$0xff]  ;;  %75 = vmatpush.bf16.msra.mxu0 %v220_v0  ;;  %v226_v4 = vld [vmem:[#allocation2 + $0x30] sm:$0xff]  ;;  %v225_v5 = vld [vmem:[#allocation2 + $0x28] sm:$0xff]  ;;  %vm170_vm2 = vcmask 15360  }
   0x7   :  { %v219_v2 = vld [vmem:[%s293_s0] sm:$0xff]  ;;  %134 = vmatpush.bf16.msra.mxu1 %v228_v1  ;;  %v223_v7 = vld [vmem:[#allocation2 + $0x18] sm:$0xff]  ;;  %v222_v8 = vld [vmem:[#allocation2 + $0x10] sm:$0xff] }
   0x8   :  { %v224_v6 = vld [vmem:[#allocation2 + $0x20] sm:$0xff]  ;;  %v221_v9 = vld [vmem:[#allocation2 + $0x8] sm:$0xff] }
   0x9   :  { %186 = vmatmul.msk.bf16.vlgmr.msra.gmra.mxu0 %vm64_vm0, %v219_v2  ;;  %v233_v10 = vld [vmem:[#allocation2 + $0x48] sm:$0xff]  }
   0xa   :  { %v231_v11 = vunpack.c.l.bf16 %v233_v10  ;;  %v232_v21 = vunpack.c.h.bf16 %v233_v10 }
   0xb   :  { %135 = vmatpush.bf16.msra.mxu1 %v227_v3 }
   0xc   :  { %v52_v13 = vperm.slane %v231_v11, 0  ;;  %v85_v20 = vperm.slane %v231_v11, 1  ;;  %v157_v24 = vperm.slane %v232_v21, 1  ;;  %v150_v25 = vperm.slane %v232_v21, 0 }
   0xd   :  { %v167_v34 = vperm.slane %v231_v11, 2 }
   0xf   :  { %136 = vmatpush.bf16.msra.mxu1 %v226_v4 }
  0x13   :  { %137 = vmatpush.bf16.msra.mxu1 %v225_v5 }
  0x17   :  { %138 = vmatpush.bf16.msra.mxu1 %v224_v6 }
  0x1b   :  { %139 = vmatpush.bf16.msra.mxu1 %v223_v7 }
  0x1f   :  { %140 = vmatpush.bf16.msra.mxu1 %v222_v8 }
  0x23   :  { %141 = vmatpush.bf16.msra.mxu1 %v221_v9 }
  0x86   :  { %v77_v12 = vpop.f32.mrf.mxu0 }
  0x87   :  { %v78_v14 = vadd.f32 %v77_v12, %v52_v13 }
  0x89   :  { %v82_v17 = vmax.f32 %v78_v14, 0.0 }
  0x8e   :  { %v79_v15 = vpop.f32.mrf.mxu0 }
  0x8f   :  { %v80_v16 = vadd.f32 %v79_v15, %v52_v13 }
  0x91   :  { %v83_v18 = vmax.f32 %v80_v16, 0.0 }
  0x93   :  { %v84_v19 = vpack.c.bf16 %v83_v18, %v82_v17 }
  0x95   :  { %142 = vmatmul.bf16.vlgmr.msra.gmra.mxu1 %v84_v19 }
 0x112   :  { %v143_v22 = vpop.f32.mrf.mxu1 }
 0x113   :  { %v144_v23 = vadd.f32 %v143_v22, %v85_v20 }
 0x115   :  { %v148_v26 = vmax.f32 %v144_v23, 0.0 }
 0x117   :  { %v158_v27 = vmul.f32 %v157_v24, %v148_v26  ;;  %v151_v28 = vmul.f32 %v150_v25, %v148_v26 }
 0x119   :  { %160 = vadd.xlane.f32.xlu1 %v158_v27  ;;  %153 = vadd.xlane.f32.xlu0 %v151_v28 }
 0x11a   :  { %v145_v29 = vpop.f32.mrf.mxu1 }
 0x11b   :  { %v146_v30 = vadd.f32 %v145_v29, %v85_v20 }
 0x11d   :  { %v149_v31 = vmax.f32 %v146_v30, 0.0 }
 0x11f   :  { %v159_v32 = vmul.f32 %v157_v24, %v149_v31  ;;  %v152_v33 = vmul.f32 %v150_v25, %v149_v31 }
 0x121   :  { %162 = vadd.xlane.f32.xlu1 %v159_v32  ;;  %155 = vadd.xlane.f32.xlu0 %v152_v33 }
 0x18c   :  { %v161_v35 = vpop.xlane.xlu1 %160  ;;  %v154_v36 = vpop.xlane.xlu0 %153 }
 0x18d   :  { %v165_v37 = vsel %vm164_vm1, %v154_v36, %v161_v35 }
 0x18e   :  { %v168_v38 = vadd.f32 %v167_v34, %v165_v37 }
 0x190   :  { %171 = vst.msk [vmem:[%s295_s2] sm:$0xff] %vm170_vm2, %v168_v38 }
 0x194   :  { %v163_v39 = vpop.xlane.xlu1 %162  ;;  %v156_v40 = vpop.xlane.xlu0 %155 }
 0x195   :  { %v166_v41 = vsel %vm164_vm1, %v156_v40, %v163_v39 }
 0x196   :  { %v169_v42 = vadd.f32 %v167_v34, %v166_v41 }
 0x198   :  { %172 = vst.msk [vmem:[%s295_s2 + $0x8] sm:$0xff] %vm170_vm2, %v169_v42 }
 0x199   :  { %177 = vsyncpa [#allocation3], 1 }

</bundles_post_ra>
